<compile_context>
chip_gen: v7x
topology: tpu7x:2x2x1
jax: 0.10.0
libtpu: 0.0.40
codegen_flags: <defaults>
</compile_context>

<pallas_src>
import math
from functools import partial

import jax
import jax.numpy as jnp
from jax import lax
from jax.experimental import pallas as pl
from jax.experimental.pallas import tpu as pltpu

BN_EPS = 1e-5


def _round_up(x, m):
    return ((x + m - 1) // m) * m


# ----------------------------- Pallas kernels --------------------------------
def _stats_kernel(wc_ref, pt_ref, y_ref, sum_ref, ssq_ref):
    """Pass 1: fused conv-GEMM for both branches + per-tile BN partial sums.

    wc_ref : [2C, Kp]   fused weights (rows 0..C-1 = branch1, C..2C-1 = branch2)
    pt_ref : [Kp, TN]   im2col patches, pixels on the lane axis
    y_ref  : [2C, TN]   raw conv outputs for this tile (consumed by pass 2)
    sum_ref/ssq_ref : [1, 2C, 1]  per-tile partial sum / sum-of-squares
    """
    y = jnp.dot(wc_ref[...], pt_ref[...], preferred_element_type=jnp.float32)
    y_ref[...] = y
    # Single-pass statistics; E[y^2] - m^2 is finished in the wrapper.  The
    # lane reductions run on the XLU and hide under the MXU/store path.
    sum_ref[0] = jnp.sum(y, axis=1, keepdims=True)
    ssq_ref[0] = jnp.sum(y * y, axis=1, keepdims=True)


def _apply_kernel(cout, y_ref, scale_ref, shift_ref, o_ref):
    """Pass 2: BN affine (precomputed scale/shift), sigmoid gate, multiply.

    y_ref : [2C, TN];  scale/shift : [2C, 1];  o_ref : [C, TN]
    """
    z = y_ref[...] * scale_ref[...] + shift_ref[...]
    z1 = z[:cout, :]          # branch 1 (gate) — tile-aligned sublane slice
    z2 = z[cout:, :]          # branch 2
    o_ref[...] = jax.nn.sigmoid(z1) * z2


# ------------------------------ JAX glue --------------------------------------
def im2col_t(x, k, stride, padding):
    """x NCHW [B,Cin,H,W] -> transposed patches [Cin*k*k, B*OH*OW].

    Row order (Cin, kh, kw) matches torch Conv2d weight layout [Cout,Cin,kh,kw];
    column order is (b, oh, ow)."""
    B, Cin, H, W = x.shape
    xp = jnp.pad(x, ((0, 0), (0, 0), (padding, padding), (padding, padding)))
    OH = (H + 2 * padding - k) // stride + 1
    OW = (W + 2 * padding - k) // stride + 1
    cols = []
    for kh in range(k):
        for kw in range(k):
            cols.append(xp[:, :, kh:kh + stride * OH:stride, kw:kw + stride * OW:stride])
    cols = jnp.stack(cols, axis=0).reshape(k, k, B, Cin, OH, OW)
    cols = cols.transpose(3, 0, 1, 2, 4, 5)                 # [Cin, kh, kw, B, OH, OW]
    return cols.reshape(Cin * k * k, B * OH * OW), OH, OW


def gating_block_forward(x, w1, g1, b1, w2, g2, b2, *, stride=1, padding=1,
                         block_n=1024):
    """x NCHW; w*: [Cout, Cin, K, K]; returns NCHW [B, Cout, OH, OW]."""
    B, Cin, H, W = x.shape
    Cout, _, K, _ = w1.shape
    Kp = Cin * K * K
    C2 = 2 * Cout

    pT, OH, OW = im2col_t(x, K, stride, padding)            # [Kp, N]
    N = B * OH * OW

    # Adaptive lane tile: as big as sensible (grid-step overhead amortization)
    # but never over-padding a small problem past the next multiple of 128.
    bn = min(block_n, _round_up(N, 128))
    bn = _round_up(bn, 128)
    nt = pl.cdiv(N, bn)
    n_pad = nt * bn

    # Pad the contraction axis to a multiple of 8 (clean sublane tiling) and
    # the pixel axis to a multiple of the tile.  Zero rows/columns contribute
    # nothing to the GEMM / statistics, and we divide by the true N below.
    Kp_pad = _round_up(Kp, 8)
    pT = jnp.pad(pT, ((0, Kp_pad - Kp), (0, n_pad - N)))

    # Fused weights: one GEMM for both branches.
    wc = jnp.concatenate([w1.reshape(Cout, Kp), w2.reshape(Cout, Kp)], axis=0)  # [2C, Kp]
    wc = jnp.pad(wc, ((0, 0), (0, Kp_pad - Kp)))

    cparams = pltpu.CompilerParams(
        dimension_semantics=("parallel",),
        vmem_limit_bytes=64 * 1024 * 1024,
    )

    # ---- pass 1: fused GEMM + partial BN statistics -------------------------
    y, part_sum, part_ssq = pl.pallas_call(
        _stats_kernel,
        out_shape=(
            jax.ShapeDtypeStruct((C2, n_pad), jnp.float32),
            jax.ShapeDtypeStruct((nt, C2, 1), jnp.float32),
            jax.ShapeDtypeStruct((nt, C2, 1), jnp.float32),
        ),
        grid_spec=pltpu.PrefetchScalarGridSpec(
            num_scalar_prefetch=0,
            grid=(nt,),
            in_specs=[
                pl.BlockSpec((C2, Kp_pad), lambda i: (0, 0)),   # weights resident
                pl.BlockSpec((Kp_pad, bn), lambda i: (0, i)),
            ],
            out_specs=(
                pl.BlockSpec((C2, bn), lambda i: (0, i)),
                pl.BlockSpec((1, C2, 1), lambda i: (i, 0, 0)),
                pl.BlockSpec((1, C2, 1), lambda i: (i, 0, 0)),
            ),
        ),
        compiler_params=cparams,
        cost_estimate=pl.CostEstimate(
            flops=2 * C2 * Kp_pad * n_pad,
            transcendentals=0,
            bytes_accessed=4 * (Kp_pad * n_pad + C2 * Kp_pad + C2 * n_pad
                                + 2 * nt * C2),
        ),
    )(wc, pT)

    # ---- tiny finalize in plain JAX: mean/var -> per-channel scale & shift ---
    tot_sum = jnp.sum(part_sum, axis=0)[:, 0]               # [2C]
    tot_ssq = jnp.sum(part_ssq, axis=0)[:, 0]               # [2C]
    inv_n = 1.0 / float(N)
    mean = tot_sum * inv_n
    var = jnp.maximum(tot_ssq * inv_n - mean * mean, 0.0)   # guard cancellation
    gamma = jnp.concatenate([g1, g2])
    beta = jnp.concatenate([b1, b2])
    scale = gamma * lax.rsqrt(var + BN_EPS)
    shift = beta - mean * scale
    scale = scale.reshape(C2, 1).astype(jnp.float32)
    shift = shift.reshape(C2, 1).astype(jnp.float32)

    # ---- pass 2: affine + sigmoid gate + multiply (lane-dense output) --------
    out_t = pl.pallas_call(
        partial(_apply_kernel, Cout),
        out_shape=jax.ShapeDtypeStruct((Cout, n_pad), jnp.float32),
        grid_spec=pltpu.PrefetchScalarGridSpec(
            num_scalar_prefetch=0,
            grid=(nt,),
            in_specs=[
                pl.BlockSpec((C2, bn), lambda i: (0, i)),
                pl.BlockSpec((C2, 1), lambda i: (0, 0)),
                pl.BlockSpec((C2, 1), lambda i: (0, 0)),
            ],
            out_specs=pl.BlockSpec((Cout, bn), lambda i: (0, i)),
        ),
        compiler_params=cparams,
        cost_estimate=pl.CostEstimate(
            flops=4 * C2 * n_pad,
            transcendentals=Cout * n_pad,
            bytes_accessed=4 * (C2 * n_pad + Cout * n_pad + 2 * C2),
        ),
    )(y, scale, shift)

    # [Cout, N] -> NCHW (small XLA transpose; columns are ordered (b, oh, ow))
    out = out_t[:, :N].reshape(Cout, B, OH, OW).transpose(1, 0, 2, 3)
    return out


# --------------------------- pure-JAX reference -------------------------------
def reference_forward(x, w1, g1, b1, w2, g2, b2, *, stride=1, padding=1):
    dn = lax.conv_dimension_numbers(x.shape, w1.shape, ("NCHW", "OIHW", "NCHW"))

    def bn(y, g, b):
        m = jnp.mean(y, axis=(0, 2, 3), keepdims=True)
        v = jnp.mean((y - m) ** 2, axis=(0, 2, 3), keepdims=True)
        return (y - m) / jnp.sqrt(v + BN_EPS) * g.reshape(1, -1, 1, 1) + b.reshape(1, -1, 1, 1)

    y1 = lax.conv_general_dilated(x, w1, (stride, stride),
                                  [(padding, padding)] * 2, dimension_numbers=dn)
    y2 = lax.conv_general_dilated(x, w2, (stride, stride),
                                  [(padding, padding)] * 2, dimension_numbers=dn)
    return jax.nn.sigmoid(bn(y1, g1, b1)) * bn(y2, g2, b2)


# ---------------------------------- main --------------------------------------
if __name__ == "__main__":
    key = jax.random.PRNGKey(0)
    B, Cin, H, W = 2, 4, 16, 16
    Cout, K, stride, padding = 8, 3, 1, 1

    k_x, k_w1, k_w2, k_g1, k_b1, k_g2, k_b2 = jax.random.split(key, 7)
    x = jax.random.normal(k_x, (B, Cin, H, W), dtype=jnp.float32)

    # kaiming_uniform_ (a=0, fan_in): bound = sqrt(2) * sqrt(3 / fan_in)
    fan_in = Cin * K * K
    bound = math.sqrt(2.0) * math.sqrt(3.0 / fan_in)
    w1 = jax.random.uniform(k_w1, (Cout, Cin, K, K), minval=-bound, maxval=bound,
                            dtype=jnp.float32)
    w2 = jax.random.uniform(k_w2, (Cout, Cin, K, K), minval=-bound, maxval=bound,
                            dtype=jnp.float32)
    # BatchNorm affine params (torch default gamma=1, beta=0; perturbed to
    # exercise the affine path).
    g1 = 1.0 + 0.1 * jax.random.normal(k_g1, (Cout,), dtype=jnp.float32)
    b1 = 0.1 * jax.random.normal(k_b1, (Cout,), dtype=jnp.float32)
    g2 = 1.0 + 0.1 * jax.random.normal(k_g2, (Cout,), dtype=jnp.float32)
    b2 = 0.1 * jax.random.normal(k_b2, (Cout,), dtype=jnp.float32)

    fwd = jax.jit(gating_block_forward,
                  static_argnames=("stride", "padding", "block_n"))
    out = fwd(x, w1, g1, b1, w2, g2, b2, stride=stride, padding=padding)
    out = jax.block_until_ready(out)

    ref = reference_forward(x, w1, g1, b1, w2, g2, b2,
                            stride=stride, padding=padding)
    assert out.shape == (B, Cout, H, W)
    assert jnp.allclose(out, ref, atol=1e-4, rtol=1e-4), \
        f"max err {jnp.max(jnp.abs(out - ref))}"

    print("KERNEL_OK")
</pallas_src>

<mosaic_0001>
module attributes {stable_mosaic.version = 11 : i64} {
  func.func @_stats_kernel(%arg0: i32, %arg1: memref<16x40xf32, #tpu.memory_space<vmem>>, %arg2: memref<40x512xf32, #tpu.memory_space<vmem>>, %arg3: memref<16x512xf32, #tpu.memory_space<vmem>>, %arg4: memref<1x16x1xf32, #tpu.memory_space<vmem>>, %arg5: memref<1x16x1xf32, #tpu.memory_space<vmem>>) attributes {dimension_semantics = [#tpu.dimension_semantics<parallel>], iteration_bounds = array<i64: 1>, scalar_prefetch = 0 : i64, scratch_operands = 0 : i64, tpu.core_type = #tpu.core_type<tc>, window_params = [{pipeline_mode = #tpu.pipeline_mode<synchronous>, transform_indices = @transform_0, window_bounds = array<i64: 16, 40>}, {transform_indices = @transform_1, window_bounds = array<i64: 40, 512>}, {transform_indices = @transform_2, window_bounds = array<i64: 16, 512>}, {transform_indices = @transform_3, window_bounds = array<i64: 1, 16, 1>}, {transform_indices = @transform_4, window_bounds = array<i64: 1, 16, 1>}]} {
    %c0 = arith.constant 0 : index
    %c0_0 = arith.constant 0 : index
    %0 = vector.load %arg1[%c0, %c0_0] : memref<16x40xf32, #tpu.memory_space<vmem>>, vector<16x40xf32>
    %c0_1 = arith.constant 0 : index
    %c0_2 = arith.constant 0 : index
    %1 = vector.load %arg2[%c0_1, %c0_2] : memref<40x512xf32, #tpu.memory_space<vmem>>, vector<40x512xf32>
    %cst = arith.constant dense<0.000000e+00> : vector<16x512xf32>
    %2 = tpu.matmul %0, %1, %cst {dimension_numbers = #tpu.dot_dimension_numbers<[1], [0], [0], [1], [0, 0, 1, 1], [], []>} : vector<16x40xf32>, vector<40x512xf32>, vector<16x512xf32> -> vector<16x512xf32>
    %c0_3 = arith.constant 0 : index
    %c0_4 = arith.constant 0 : index
    %3 = vector.load %arg3[%c0_3, %c0_4] : memref<16x512xf32, #tpu.memory_space<vmem>>, vector<16x512xf32>
    tpu.vector_store %arg3[%c0_3, %c0_4], %2 {strides = array<i32>} : memref<16x512xf32, #tpu.memory_space<vmem>>, vector<16x512xf32>,
    %cst_5 = arith.constant dense<0.000000e+00> : vector<16xf32>
    %4 = vector.multi_reduction <add>, %2, %cst_5 [1] : vector<16x512xf32> to vector<16xf32>
    %5 = vector.shape_cast %4 : vector<16xf32> to vector<16x1xf32>
    %c0_6 = arith.constant 0 : index
    %c0_7 = arith.constant 0 : index
    %c0_8 = arith.constant 0 : index
    %6 = vector.load %arg4[%c0_6, %c0_7, %c0_8] : memref<1x16x1xf32, #tpu.memory_space<vmem>>, vector<1x16x1xf32>
    %7 = vector.shape_cast %6 : vector<1x16x1xf32> to vector<16x1xf32>
    %8 = vector.shape_cast %5 : vector<16x1xf32> to vector<1x16x1xf32>
    tpu.vector_store %arg4[%c0_6, %c0_7, %c0_8], %8 {strides = array<i32>} : memref<1x16x1xf32, #tpu.memory_space<vmem>>, vector<1x16x1xf32>,
    %9 = arith.mulf %2, %2 : vector<16x512xf32>
    %cst_9 = arith.constant dense<0.000000e+00> : vector<16xf32>
    %10 = vector.multi_reduction <add>, %9, %cst_9 [1] : vector<16x512xf32> to vector<16xf32>
    %11 = vector.shape_cast %10 : vector<16xf32> to vector<16x1xf32>
    %c0_10 = arith.constant 0 : index
    %c0_11 = arith.constant 0 : index
    %c0_12 = arith.constant 0 : index
    %12 = vector.load %arg5[%c0_10, %c0_11, %c0_12] : memref<1x16x1xf32, #tpu.memory_space<vmem>>, vector<1x16x1xf32>
    %13 = vector.shape_cast %12 : vector<1x16x1xf32> to vector<16x1xf32>
    %14 = vector.shape_cast %11 : vector<16x1xf32> to vector<1x16x1xf32>
    tpu.vector_store %arg5[%c0_10, %c0_11, %c0_12], %14 {strides = array<i32>} : memref<1x16x1xf32, #tpu.memory_space<vmem>>, vector<1x16x1xf32>,
    return
  }
  func.func @transform_0(%arg0: i32) -> (i32, i32) {
    %c0_i32 = arith.constant 0 : i32
    %c0_i32_0 = arith.constant 0 : i32
    %c0_i32_1 = arith.constant 0 : i32
    return %c0_i32, %c0_i32_0 : i32, i32
  }
  func.func @transform_1(%arg0: i32) -> (i32, i32) {
    %c0_i32 = arith.constant 0 : i32
    %c0_i32_0 = arith.constant 0 : i32
    return %c0_i32, %arg0 : i32, i32
  }
  func.func @transform_2(%arg0: i32) -> (i32, i32) {
    %c0_i32 = arith.constant 0 : i32
    %c0_i32_0 = arith.constant 0 : i32
    return %c0_i32, %arg0 : i32, i32
  }
  func.func @transform_3(%arg0: i32) -> (i32, i32, i32) {
    %c0_i32 = arith.constant 0 : i32
    %c0_i32_0 = arith.constant 0 : i32
    %c0_i32_1 = arith.constant 0 : i32
    return %arg0, %c0_i32, %c0_i32_0 : i32, i32, i32
  }
  func.func @transform_4(%arg0: i32) -> (i32, i32, i32) {
    %c0_i32 = arith.constant 0 : i32
    %c0_i32_0 = arith.constant 0 : i32
    %c0_i32_1 = arith.constant 0 : i32
    return %arg0, %c0_i32, %c0_i32_0 : i32, i32, i32
  }
}

module attributes {stable_mosaic.version = 11 : i64} {
  func.func @_apply_kernel(%arg0: i32, %arg1: memref<16x512xf32, #tpu.memory_space<vmem>>, %arg2: memref<16x1xf32, #tpu.memory_space<vmem>>, %arg3: memref<16x1xf32, #tpu.memory_space<vmem>>, %arg4: memref<8x512xf32, #tpu.memory_space<vmem>>) attributes {dimension_semantics = [#tpu.dimension_semantics<parallel>], iteration_bounds = array<i64: 1>, scalar_prefetch = 0 : i64, scratch_operands = 0 : i64, tpu.core_type = #tpu.core_type<tc>, window_params = [{transform_indices = @transform_0, window_bounds = array<i64: 16, 512>}, {pipeline_mode = #tpu.pipeline_mode<synchronous>, transform_indices = @transform_1, window_bounds = array<i64: 16, 1>}, {pipeline_mode = #tpu.pipeline_mode<synchronous>, transform_indices = @transform_2, window_bounds = array<i64: 16, 1>}, {transform_indices = @transform_3, window_bounds = array<i64: 8, 512>}]} {
    %c0 = arith.constant 0 : index
    %c0_0 = arith.constant 0 : index
    %0 = vector.load %arg1[%c0, %c0_0] : memref<16x512xf32, #tpu.memory_space<vmem>>, vector<16x512xf32>
    %c0_1 = arith.constant 0 : index
    %c0_2 = arith.constant 0 : index
    %1 = vector.load %arg2[%c0_1, %c0_2] : memref<16x1xf32, #tpu.memory_space<vmem>>, vector<16x1xf32>
    %2 = vector.broadcast %1 : vector<16x1xf32> to vector<16x512xf32>
    %3 = arith.mulf %0, %2 : vector<16x512xf32>
    %c0_3 = arith.constant 0 : index
    %c0_4 = arith.constant 0 : index
    %4 = vector.load %arg3[%c0_3, %c0_4] : memref<16x1xf32, #tpu.memory_space<vmem>>, vector<16x1xf32>
    %5 = vector.broadcast %4 : vector<16x1xf32> to vector<16x512xf32>
    %6 = arith.addf %3, %5 : vector<16x512xf32>
    %7 = vector.extract_strided_slice %6 {offsets = [0, 0], sizes = [8, 512], strides = [1, 1]} : vector<16x512xf32> to vector<8x512xf32>
    %8 = vector.extract_strided_slice %6 {offsets = [8, 0], sizes = [8, 512], strides = [1, 1]} : vector<16x512xf32> to vector<8x512xf32>
    %9 = arith.negf %7 : vector<8x512xf32>
    %10 = math.exp %9 : vector<8x512xf32>
    %cst = arith.constant 1.000000e+00 : f32
    %11 = vector.broadcast %cst : f32 to vector<8x512xf32>
    %12 = arith.addf %11, %10 : vector<8x512xf32>
    %13 = arith.divf %11, %12 : vector<8x512xf32>
    %14 = arith.mulf %13, %8 : vector<8x512xf32>
    %c0_5 = arith.constant 0 : index
    %c0_6 = arith.constant 0 : index
    %15 = vector.load %arg4[%c0_5, %c0_6] : memref<8x512xf32, #tpu.memory_space<vmem>>, vector<8x512xf32>
    tpu.vector_store %arg4[%c0_5, %c0_6], %14 {strides = array<i32>} : memref<8x512xf32, #tpu.memory_space<vmem>>, vector<8x512xf32>,
    return
  }
  func.func @transform_0(%arg0: i32) -> (i32, i32) {
    %c0_i32 = arith.constant 0 : i32
    %c0_i32_0 = arith.constant 0 : i32
    return %c0_i32, %arg0 : i32, i32
  }
  func.func @transform_1(%arg0: i32) -> (i32, i32) {
    %c0_i32 = arith.constant 0 : i32
    %c0_i32_0 = arith.constant 0 : i32
    %c0_i32_1 = arith.constant 0 : i32
    return %c0_i32, %c0_i32_0 : i32, i32
  }
  func.func @transform_2(%arg0: i32) -> (i32, i32) {
    %c0_i32 = arith.constant 0 : i32
    %c0_i32_0 = arith.constant 0 : i32
    %c0_i32_1 = arith.constant 0 : i32
    return %c0_i32, %c0_i32_0 : i32, i32
  }
  func.func @transform_3(%arg0: i32) -> (i32, i32) {
    %c0_i32 = arith.constant 0 : i32
    %c0_i32_0 = arith.constant 0 : i32
    return %c0_i32, %arg0 : i32, i32
  }
}

</mosaic_0001>

<bundles_post_ra>
// kernel: gating_block_forward.2
= control target key start
LH: loop header
LB: loop body
LE: loop exit
PB: predicated region body
PF: predicated region fallthrough
CT: control target
= control target key end

     0   :  { %10 = vsyncpa [#allocation3], 0  ;;  %s586_s0 = inlined_call_operand.hbm [shape: f32[16,40], index: 0, kind: input, shape index: {}]   ;;  %s587_s1 = inlined_call_operand.hbm [shape: f32[40,512], index: 1, kind: input, shape index: {}]   ;;  %s588_s2 = inlined_call_operand.hbm [shape: f32[16,512], index: 2, kind: output, shape index: {0}]   ;;  %s589_s3 = inlined_call_operand.hbm [shape: f32[1,16,1], index: 3, kind: output, shape index: {1}]   ;;  %s590_s4 = inlined_call_operand.hbm [shape: f32[1,16,1], index: 4, kind: output, shape index: {2}]  }
   0x1   :  { %11 = vsyncpa [#allocation6], 0 }
   0x2   :  { %12 = vsyncpa [#allocation4], 0 }
   0x3   :  { %13 = vsyncpa [#allocation9], 0  ;;  %s465_s15 = smov [#allocation2]   ;;  %s347_s19 = scalar_lea.hbm %s586_s0, 256 }
   0x4   :  { %s19_s16 = sshll.u32 %s465_s15, 4  ;;  %p348_p0 = scmp.ne.s32.totalorder %s586_s0, %s347_s19  ;;  %s20_s16 = int_to_ptr.vmem [resolvable:$true] %s19_s16 }
   0x5   :  { %p351_p1 = scmp.lt.u32.totalorder %s347_s19, %s586_s0 }
   0x7   :  { %p353_p2 = pnand %p351_p1, %p348_p0 }
   0x9   :  { %356 = shalt.err (!%p353_p2)
}
   0xa   :  { %s357_s24 = scalar_lea.vmem %s20_s16, 256  ;;  %p362_p4 = scmp.lt.s32.totalorder %s20_s16, %s20_s16 }
   0xb   :  { %p358_p3 = scmp.ne.s32.totalorder %s20_s16, %s357_s24  ;;  %p363_p5 = scmp.lt.s32.totalorder %s357_s24, %s357_s24 }
   0xd   :  { %p364_p6 = por %p363_p5, %p362_p4 }
   0xf   :  { %p365_p7 = pnand %p364_p6, %p358_p3 }
  0x11   :  { %368 = shalt.err (!%p365_p7)
}
  0x12   :  { %s466_s25 = smov 128   ;;  %s467_s26 = smov 8  }
  0x13   :  { %25 = dma.hbm_to_vmem [thread:$0]  %s586_s0, 256, %s20_s16, [#allocation3], %s466_s25, %s466_s25, %s467_s26  }
  0x14   :  { %s468_s29 = smov [#allocation5]   ;;  %s369_s7 = scalar_lea.hbm %s587_s1, 2560 }
  0x15   :  { %s31_s30 = sshll.u32 %s468_s29, 4  ;;  %p370_p8 = scmp.ne.s32.totalorder %s587_s1, %s369_s7  ;;  %s32_s30 = int_to_ptr.vmem [resolvable:$true] %s31_s30 }
  0x16   :  { %p373_p9 = scmp.lt.u32.totalorder %s369_s7, %s587_s1 }
  0x18   :  { %p375_p10 = pnand %p373_p9, %p370_p8 }
  0x1a   :  { %378 = shalt.err (!%p375_p10)
}
  0x1b   :  { %s379_s12 = scalar_lea.vmem %s32_s30, 2560  ;;  %p384_p12 = scmp.lt.s32.totalorder %s32_s30, %s32_s30 }
  0x1c   :  { %p380_p11 = scmp.ne.s32.totalorder %s32_s30, %s379_s12  ;;  %p385_p13 = scmp.lt.s32.totalorder %s379_s12, %s379_s12 }
  0x1e   :  { %p386_p0 = por %p385_p13, %p384_p12 }
  0x20   :  { %p387_p1 = pnand %p386_p0, %p380_p11 }
  0x22   :  { %390 = shalt.err (!%p387_p1)
}
  0x23   :  { %s469_s0 = smov 512   ;;  %s470_s13 = smov 32  }
  0x24   :  { %37 = dma.hbm_to_vmem [thread:$0]  %s587_s1, 2560, %s32_s30, [#allocation6], %s469_s0, %s469_s0, %s470_s13  }
  0x25   :  { %457 = dma.done.wait [#allocation3], 256  }
  0x26   :  { %458 = vsyncadd [#allocation3], 4294967040 }
  0x27   :  { %459 = dma.done.wait [#allocation6], 2560  }
  0x28   :  { %460 = vsyncadd [#allocation6], 4294964736  ;;  %v471_v0 = vmov 0.0   ;;  %v47_v1 = vld [vmem:[#allocation5 + $0x8] sm:$0xff]  ;;  %v46_v3 = vld [vmem:[#allocation5] sm:$0xff]  ;;  %vm66_vm0 = vcmask 326656  }
  0x29   :  { %137 = vmatprep.mubr.f32.mxu0 %v471_v0  ;;  %214 = vmatprep.mubr.f32.mxu1 %v471_v0  ;;  %v51_v2 = vld [vmem:[#allocation5 + $0x28] sm:$0xff]  ;;  %v50_v5 = vld [vmem:[#allocation5 + $0x20] sm:$0xff]  ;;  %v49_v6 = vld [vmem:[#allocation5 + $0x18] sm:$0xff]  ;;  %s472_s1 = smov [#allocation7]  }
  0x2a   :  { %v321_v4 = vpack.c.bf16 %v51_v2, %v47_v1  ;;  %v53_v7 = vld [vmem:[#allocation5 + $0x38] sm:$0xff]  ;;  %v323_v8 = vpack.c.bf16 %v50_v5, %v46_v3  ;;  %v48_v10 = vld [vmem:[#allocation5 + $0x10] sm:$0xff]  ;;  %v55_v12 = vld [vmem:[#allocation5 + $0x48] sm:$0xff]  ;;  %s273_s16 = sshll.u32 %s472_s1, 4  ;;  %s274_s16 = int_to_ptr.vmem [resolvable:$true] %s273_s16 }
  0x2b   :  { %v329_v9 = vpack.c.bf16 %v53_v7, %v49_v6  ;;  %v52_v11 = vld [vmem:[#allocation5 + $0x30] sm:$0xff]  ;;  %v59_v14 = vld [vmem:[#allocation5 + $0x68] sm:$0xff]  ;;  %v54_v15 = vld [vmem:[#allocation5 + $0x40] sm:$0xff]  ;;  %s391_s17 = scalar_lea.vmem %s274_s16, 1024  ;;  %p396_p3 = scmp.lt.s32.totalorder %s274_s16, %s274_s16 }
  0x2c   :  { %322 = vmatprep.subr.bf16.mxu0 %v321_v4  ;;  %v331_v13 = vpack.c.bf16 %v52_v11, %v48_v10  ;;  %v58_v16 = vld [vmem:[#allocation5 + $0x60] sm:$0xff]  ;;  %v325_v17 = vpack.c.bf16 %v59_v14, %v55_v12  ;;  %v57_v19 = vld [vmem:[#allocation5 + $0x58] sm:$0xff]  ;;  %v56_v21 = vld [vmem:[#allocation5 + $0x50] sm:$0xff]  ;;  %p392_p2 = scmp.ne.s32.totalorder %s274_s16, %s391_s17  ;;  %p397_p4 = scmp.lt.s32.totalorder %s391_s17, %s391_s17 }
  0x2d   :  { %324 = vmatpush1.bf16.msra.mxu0 %v323_v8  ;;  %330 = vmatprep.subr.bf16.mxu1 %v329_v9  ;;  %v327_v18 = vpack.c.bf16 %v58_v16, %v54_v15  ;;  %v61_v20 = vld [vmem:[#allocation5 + $0x78] sm:$0xff]  ;;  %v60_v23 = vld [vmem:[#allocation5 + $0x70] sm:$0xff]  ;;  %v63_v25 = vld [vmem:[#allocation5 + $0x88] sm:$0xff] }
  0x2e   :  { %332 = vmatpush1.bf16.msra.mxu1 %v331_v13  ;;  %v333_v22 = vpack.c.bf16 %v61_v20, %v57_v19  ;;  %326 = vmatprep.subr.bf16.mxu0 %v325_v17  ;;  %v335_v24 = vpack.c.bf16 %v60_v23, %v56_v21  ;;  %v65_v26 = vld [vmem:[#allocation5 + $0x98] sm:$0xff]  ;;  %v62_v27 = vld [vmem:[#allocation5 + $0x80] sm:$0xff]  ;;  %v44_v28 = vld [vmem:[#allocation2] sm:$0xff]  ;;  %p398_p5 = por %p397_p4, %p396_p3 }
  0x2f   :  { %v64_v29 = vld [vmem:[#allocation5 + $0x90] sm:$0xff]  ;;  %v45_v30 = vld [vmem:[#allocation2 + $0x8] sm:$0xff] }
  0x30   :  { %334 = vmatprep.subr.bf16.mxu1 %v333_v22  ;;  %p399_p6 = pnand %p398_p5, %p392_p2 }
  0x31   :  { %328 = vmatpush1.bf16.msra.mxu0 %v327_v18 }
  0x32   :  { %336 = vmatpush1.bf16.msra.mxu1 %v335_v24  ;;  %81 = vmatprep.subr.mxu0 %v63_v25 }
  0x33   :  { %158 = vmatprep.subr.mxu1 %v65_v26 }
  0x35   :  { %82 = vmatpush1.msra.mxu0 %v62_v27 }
  0x36   :  { %317 = vmatmul.mubr.msk.f32.vlgmr.msra.gmra.mrb[0].mxu0 %vm66_vm0, %v44_v28  ;;  %159 = vmatpush1.msra.mxu1 %v64_v29 }
  0x37   :  { %319 = vmatmul.mubr.msk.f32.vlgmr.msra.gmra.mrb[0].mxu1 %vm66_vm0, %v44_v28  ;;  %143 = vmatprep.mubr.f32.mxu0 %v471_v0 }
  0x38   :  { %220 = vmatprep.mubr.f32.mxu1 %v471_v0 }
  0x3a   :  { %318 = vmatmul.mubr.msk.f32.gmra.mrb[2].mxu0 %vm66_vm0, %v45_v30 }
  0x3b   :  { %320 = vmatmul.mubr.msk.f32.gmra.mrb[2].mxu1 %vm66_vm0, %v45_v30 }
 0x109   :  { %v139_v31 = vpop.f32.mrb[0].mxu0 }
 0x10a   :  { %227 = vst [vmem:[#allocation7] sm:$0xff] %v139_v31  ;;  %v248_v32 = vmul.f32 %v139_v31, %v139_v31  ;;  %v141_v33 = vpop.f32.mrb[1].mxu0  ;;  %v216_v34 = vpop.f32.mrb[0].mxu1 }
 0x10b   :  { %228 = vst [vmem:[#allocation7 + $0x8] sm:$0xff] %v141_v33  ;;  %v235_v35 = vadd.f32 %v141_v33, %v139_v31  ;;  %v249_v36 = vmul.f32 %v141_v33, %v141_v33  ;;  %229 = vst [vmem:[#allocation7 + $0x10] sm:$0xff] %v216_v34  ;;  %v218_v37 = vpop.f32.mrb[1].mxu1  ;;  %v250_v38 = vmul.f32 %v216_v34, %v216_v34 }
 0x10c   :  { %230 = vst [vmem:[#allocation7 + $0x18] sm:$0xff] %v218_v37  ;;  %v251_v50 = vmul.f32 %v218_v37, %v218_v37 }
 0x10d   :  { %v145_v39 = vpop.f32.mrb[2].mxu0  ;;  %v236_v40 = vadd.f32 %v235_v35, %v216_v34  ;;  %v256_v41 = vadd.f32 %v249_v36, %v248_v32 }
 0x10e   :  { %231 = vst [vmem:[#allocation7 + $0x20] sm:$0xff] %v145_v39  ;;  %v252_v42 = vmul.f32 %v145_v39, %v145_v39  ;;  %v147_v43 = vpop.f32.mrb[3].mxu0  ;;  %v222_v44 = vpop.f32.mrb[2].mxu1 }
 0x10f   :  { %232 = vst [vmem:[#allocation7 + $0x28] sm:$0xff] %v147_v43  ;;  %v240_v45 = vadd.f32 %v147_v43, %v145_v39  ;;  %v253_v46 = vmul.f32 %v147_v43, %v147_v43  ;;  %233 = vst [vmem:[#allocation7 + $0x30] sm:$0xff] %v222_v44  ;;  %v254_v47 = vmul.f32 %v222_v44, %v222_v44  ;;  %v224_v48 = vpop.f32.mrb[3].mxu1 }
 0x110   :  { %v237_v49 = vadd.f32 %v236_v40, %v218_v37  ;;  %234 = vst [vmem:[#allocation7 + $0x38] sm:$0xff] %v224_v48  ;;  %v257_v51 = vadd.f32 %v256_v41, %v250_v38  ;;  %v255_v55 = vmul.f32 %v224_v48, %v224_v48 }
 0x111   :  { %v261_v52 = vadd.f32 %v253_v46, %v252_v42  ;;  %v241_v53 = vadd.f32 %v240_v45, %v222_v44 }
 0x112   :  { %238 = vadd.xlane.f32.xlu0 %v237_v49  ;;  %v258_v54 = vadd.f32 %v257_v51, %v251_v50 }
 0x113   :  { %v242_v56 = vadd.f32 %v241_v53, %v224_v48  ;;  %v262_v57 = vadd.f32 %v261_v52, %v254_v47 }
 0x114   :  { %259 = vadd.xlane.f32.xlu1 %v258_v54 }
 0x115   :  { %v263_v58 = vadd.f32 %v262_v57, %v255_v55 }
 0x116   :  { %243 = vadd.xlane.f32.xlu0 %v242_v56 }
 0x118   :  { %264 = vadd.xlane.f32.xlu1 %v263_v58 }
 0x119   :  { %402 = shalt.err (!%p399_p6)
}
 0x11a   :  { %s403_s20 = scalar_lea.hbm %s588_s2, 1024 }
 0x11b   :  { %p404_p7 = scmp.ne.s32.totalorder %s588_s2, %s403_s20  ;;  %p407_p8 = scmp.lt.u32.totalorder %s403_s20, %s588_s2 }
 0x11d   :  { %p409_p9 = pnand %p407_p8, %p404_p7 }
 0x11f   :  { %412 = shalt.err (!%p409_p9)
}
 0x120   :  { %279 = dma.vmem_to_hbm [thread:$0]  %s274_s16, 1024, %s588_s2, [#allocation4], %s469_s0, %s469_s0, %s470_s13   ;;  %vm245_vm1 = vcmask 7168  }
 0x121   :  { %s473_s29 = smov [#allocation8]   ;;  %s474_s5 = smov [#allocation10]  }
 0x122   :  { %s285_s30 = sshll.u32 %s473_s29, 4  ;;  %s297_s6 = sshll.u32 %s474_s5, 4  ;;  %s286_s30 = int_to_ptr.vmem [resolvable:$true] %s285_s30  ;;  %s548_s6 = int_to_ptr.vmem [resolvable:$true] %s297_s6 }
 0x123   :  { %s413_s7 = scalar_lea.vmem %s286_s30, 256  ;;  %p418_p11 = scmp.lt.s32.totalorder %s286_s30, %s286_s30 }
 0x124   :  { %p414_p10 = scmp.ne.s32.totalorder %s286_s30, %s413_s7  ;;  %p419_p12 = scmp.lt.s32.totalorder %s413_s7, %s413_s7 }
 0x126   :  { %p420_p13 = por %p419_p12, %p418_p11 }
 0x128   :  { %p421_p0 = pnand %p420_p13, %p414_p10 }
 0x19f   :  { %v239_v59 = vpop.xlane.xlu0 %238 }
 0x1a0   :  { %246 = vst.msk [vmem:[#allocation8] sm:$0xff] %vm245_vm1, %v239_v59 }
 0x1a1   :  { %v260_v60 = vpop.xlane.xlu1 %259 }
 0x1a2   :  { %266 = vst.msk [vmem:[#allocation10] sm:$0xff] %vm245_vm1, %v260_v60 }
 0x1a3   :  { %v244_v61 = vpop.xlane.xlu0 %243 }
 0x1a4   :  { %247 = vst.msk [vmem:[#allocation8 + $0x8] sm:$0xff] %vm245_vm1, %v244_v61 }
 0x1a5   :  { %424 = shalt.err (!%p421_p0)
}
 0x1a6   :  { %s425_s9 = scalar_lea.hbm %s589_s3, 256 }
 0x1a7   :  { %p426_p1 = scmp.ne.s32.totalorder %s589_s3, %s425_s9  ;;  %p429_p2 = scmp.lt.u32.totalorder %s425_s9, %s589_s3 }
 0x1a9   :  { %p431_p3 = pnand %p429_p2, %p426_p1 }
 0x1ab   :  { %434 = shalt.err (!%p431_p3)
}
 0x1ac   :  { %291 = dma.vmem_to_hbm [thread:$0]  %s286_s30, 256, %s589_s3, [#allocation9], %s466_s25, %s466_s25, %s467_s26   ;;  %v265_v62 = vpop.xlane.xlu1 %264 }
 0x1ad   :  { %267 = vst.msk [vmem:[#allocation10 + $0x8] sm:$0xff] %vm245_vm1, %v265_v62  ;;  %s435_s15 = scalar_lea.vmem %s548_s6, 256  ;;  %p440_p5 = scmp.lt.s32.totalorder %s548_s6, %s548_s6 }
 0x1ae   :  { %p436_p4 = scmp.ne.s32.totalorder %s548_s6, %s435_s15  ;;  %p441_p6 = scmp.lt.s32.totalorder %s435_s15, %s435_s15 }
 0x1b0   :  { %p442_p7 = por %p441_p6, %p440_p5 }
 0x1b2   :  { %p443_p8 = pnand %p442_p7, %p436_p4 }
 0x1b4   :  { %446 = shalt.err (!%p443_p8)
}
 0x1b5   :  { %s447_s17 = scalar_lea.hbm %s590_s4, 256 }
 0x1b6   :  { %p448_p9 = scmp.ne.s32.totalorder %s590_s4, %s447_s17  ;;  %p451_p10 = scmp.lt.u32.totalorder %s447_s17, %s590_s4 }
 0x1b8   :  { %p453_p11 = pnand %p451_p10, %p448_p9 }
 0x1ba   :  { %456 = shalt.err (!%p453_p11)
}
 0x1bb   :  { %303 = dma.vmem_to_hbm [thread:$0]  %s548_s6, 256, %s590_s4, [#allocation9], %s466_s25, %s466_s25, %s467_s26  }
 0x1bc   :  { %461 = dma.done.wait [#allocation4], 1024  }
 0x1bd   :  { %462 = vsyncadd [#allocation4], 4294966272 }
 0x1be   :  { %463 = dma.done.wait [#allocation9], 512  }
 0x1bf   :  { %464 = vsyncadd [#allocation9], 4294966784 }
 0x1c0   :  { %313 = vsyncpa [#allocation3], 1 }
 0x1c1   :  { %314 = vsyncpa [#allocation6], 1 }
 0x1c2   :  { %315 = vsyncpa [#allocation4], 1 }
 0x1c3   :  { %316 = vsyncpa [#allocation9], 1 }

// kernel: gating_block_forward.3
= control target key start
LH: loop header
LB: loop body
LE: loop exit
PB: predicated region body
PF: predicated region fallthrough
CT: control target
= control target key end

     0   :  { %8 = vsyncpa [#allocation3], 0  ;;  %s360_s0 = inlined_call_operand.hbm [shape: f32[16,512], index: 0, kind: input, shape index: {}]   ;;  %s361_s1 = inlined_call_operand.hbm [shape: f32[16,1], index: 1, kind: input, shape index: {}]   ;;  %s362_s2 = inlined_call_operand.hbm [shape: f32[16,1], index: 2, kind: input, shape index: {}]   ;;  %s363_s3 = inlined_call_operand.hbm [shape: f32[8,512], index: 3, kind: output, shape index: {}]  }
   0x1   :  { %9 = vsyncpa [#allocation6], 0 }
   0x2   :  { %10 = vsyncpa [#allocation4], 0  ;;  %s277_s12 = smov [#allocation5]   ;;  %s183_s16 = scalar_lea.hbm %s361_s1, 256 }
   0x3   :  { %s28_s13 = sshll.u32 %s277_s12, 4  ;;  %p184_p0 = scmp.ne.s32.totalorder %s361_s1, %s183_s16  ;;  %s29_s13 = int_to_ptr.vmem [resolvable:$true] %s28_s13 }
   0x4   :  { %p187_p1 = scmp.lt.u32.totalorder %s183_s16, %s361_s1 }
   0x6   :  { %p189_p2 = pnand %p187_p1, %p184_p0 }
   0x8   :  { %192 = shalt.err (!%p189_p2)
}
   0x9   :  { %s193_s21 = scalar_lea.vmem %s29_s13, 256  ;;  %p198_p4 = scmp.lt.s32.totalorder %s29_s13, %s29_s13 }
   0xa   :  { %p194_p3 = scmp.ne.s32.totalorder %s29_s13, %s193_s21  ;;  %p199_p5 = scmp.lt.s32.totalorder %s193_s21, %s193_s21 }
   0xc   :  { %p200_p6 = por %p199_p5, %p198_p4 }
   0xe   :  { %p201_p7 = pnand %p200_p6, %p194_p3 }
  0x10   :  { %204 = shalt.err (!%p201_p7)
}
  0x11   :  { %s278_s22 = smov 128   ;;  %s279_s23 = smov 8  }
  0x12   :  { %34 = dma.hbm_to_vmem [thread:$0]  %s361_s1, 256, %s29_s13, [#allocation6], %s278_s22, %s278_s22, %s279_s23  }
  0x13   :  { %s280_s26 = smov [#allocation2]   ;;  %s205_s30 = scalar_lea.hbm %s360_s0, 1024 }
  0x14   :  { %s16_s27 = sshll.u32 %s280_s26, 4  ;;  %p206_p8 = scmp.ne.s32.totalorder %s360_s0, %s205_s30  ;;  %s17_s27 = int_to_ptr.vmem [resolvable:$true] %s16_s27 }
  0x15   :  { %p209_p9 = scmp.lt.u32.totalorder %s205_s30, %s360_s0 }
  0x17   :  { %p211_p10 = pnand %p209_p9, %p206_p8 }
  0x19   :  { %214 = shalt.err (!%p211_p10)
}
  0x1a   :  { %s215_s8 = scalar_lea.vmem %s17_s27, 1024  ;;  %p220_p12 = scmp.lt.s32.totalorder %s17_s27, %s17_s27 }
  0x1b   :  { %p216_p11 = scmp.ne.s32.totalorder %s17_s27, %s215_s8  ;;  %p221_p13 = scmp.lt.s32.totalorder %s215_s8, %s215_s8 }
  0x1d   :  { %p222_p0 = por %p221_p13, %p220_p12 }
  0x1f   :  { %p223_p1 = pnand %p222_p0, %p216_p11 }
  0x21   :  { %226 = shalt.err (!%p223_p1)
}
  0x22   :  { %s281_s1 = smov 512   ;;  %s282_s9 = smov 32  }
  0x23   :  { %22 = dma.hbm_to_vmem [thread:$0]  %s360_s0, 1024, %s17_s27, [#allocation3], %s281_s1, %s281_s1, %s282_s9  }
  0x24   :  { %s283_s12 = smov [#allocation7]   ;;  %s227_s16 = scalar_lea.hbm %s362_s2, 256 }
  0x25   :  { %s40_s13 = sshll.u32 %s283_s12, 4  ;;  %p228_p2 = scmp.ne.s32.totalorder %s362_s2, %s227_s16  ;;  %s41_s13 = int_to_ptr.vmem [resolvable:$true] %s40_s13 }
  0x26   :  { %p231_p3 = scmp.lt.u32.totalorder %s227_s16, %s362_s2 }
  0x28   :  { %p233_p4 = pnand %p231_p3, %p228_p2 }
  0x2a   :  { %236 = shalt.err (!%p233_p4)
}
  0x2b   :  { %s237_s21 = scalar_lea.vmem %s41_s13, 256  ;;  %p242_p6 = scmp.lt.s32.totalorder %s41_s13, %s41_s13 }
  0x2c   :  { %p238_p5 = scmp.ne.s32.totalorder %s41_s13, %s237_s21  ;;  %p243_p7 = scmp.lt.s32.totalorder %s237_s21, %s237_s21 }
  0x2e   :  { %p244_p8 = por %p243_p7, %p242_p6 }
  0x30   :  { %p245_p9 = pnand %p244_p8, %p238_p5 }
  0x32   :  { %248 = shalt.err (!%p245_p9)
}
  0x33   :  { %46 = dma.hbm_to_vmem [thread:$0]  %s362_s2, 256, %s41_s13, [#allocation6], %s278_s22, %s278_s22, %s279_s23  }
  0x34   :  { %271 = dma.done.wait [#allocation3], 1024  }
  0x35   :  { %272 = vsyncadd [#allocation3], 4294966272 }
  0x36   :  { %273 = dma.done.wait [#allocation6], 512  }
  0x37   :  { %274 = vsyncadd [#allocation6], 4294966784  ;;  %v284_v0 = vmov 0   ;;  %v64_v1 = vld [vmem:[#allocation5] sm:$0xff]  ;;  %v65_v2 = vld [vmem:[#allocation5 + $0x8] sm:$0xff]  ;;  %s285_s2 = smov [#allocation8]  }
  0x38   :  { %165 = vset.pattern.permute.xlu0 %v284_v0  ;;  %166 = vset.pattern.permute.xlu1 %v284_v0  ;;  %v84_v3 = vld [vmem:[#allocation7] sm:$0xff]  ;;  %v85_v4 = vld [vmem:[#allocation7 + $0x8] sm:$0xff]  ;;  %v56_v5 = vld [vmem:[#allocation2] sm:$0xff]  ;;  %s142_s22 = sshll.u32 %s285_s2, 4  ;;  %s143_s22 = int_to_ptr.vmem [resolvable:$true] %s142_s22 }
  0x39   :  { %68 = vperm.xlu0 %165, %v64_v1   ;;  %73 = vperm.xlu1 %166, %v65_v2   ;;  %v57_v7 = vld [vmem:[#allocation2 + $0x8] sm:$0xff]  ;;  %v58_v8 = vld [vmem:[#allocation2 + $0x10] sm:$0xff]  ;;  %v59_v9 = vld [vmem:[#allocation2 + $0x18] sm:$0xff]  ;;  %s249_s23 = scalar_lea.vmem %s143_s22, 512  ;;  %p254_p11 = scmp.lt.s32.totalorder %s143_s22, %s143_s22 }
  0x3a   :  { %v60_v32 = vld [vmem:[#allocation2 + $0x20] sm:$0xff]  ;;  %v61_v33 = vld [vmem:[#allocation2 + $0x28] sm:$0xff]  ;;  %v62_v34 = vld [vmem:[#allocation2 + $0x30] sm:$0xff]  ;;  %p250_p10 = scmp.ne.s32.totalorder %s143_s22, %s249_s23  ;;  %p255_p12 = scmp.lt.s32.totalorder %s249_s23, %s249_s23 }
  0x3b   :  { %v63_v35 = vld [vmem:[#allocation2 + $0x38] sm:$0xff] }
  0x3c   :  { %p256_p13 = por %p255_p12, %p254_p11 }
  0x3d   :  { %88 = vperm.xlu0 %165, %v84_v3   ;;  %93 = vperm.xlu1 %166, %v85_v4  }
  0x3e   :  { %p257_p0 = pnand %p256_p13, %p250_p10 }
  0xb8   :  { %v69_v6 = vpop.permute.xlu0 %68  ;;  %v74_v30 = vpop.permute.xlu1 %73 }
  0xb9   :  { %v76_v10 = vmul.f32 %v69_v6, %v56_v5  ;;  %v77_v11 = vmul.f32 %v69_v6, %v57_v7  ;;  %v78_v12 = vmul.f32 %v69_v6, %v58_v8  ;;  %v79_v13 = vmul.f32 %v69_v6, %v59_v9 }
  0xba   :  { %v80_v36 = vmul.f32 %v74_v30, %v60_v32  ;;  %v81_v38 = vmul.f32 %v74_v30, %v61_v33  ;;  %v82_v39 = vmul.f32 %v74_v30, %v62_v34  ;;  %v83_v40 = vmul.f32 %v74_v30, %v63_v35 }
  0xbc   :  { %v89_v14 = vpop.permute.xlu0 %88  ;;  %v94_v37 = vpop.permute.xlu1 %93 }
  0xbd   :  { %v96_v15 = vadd.f32 %v89_v14, %v76_v10  ;;  %v97_v16 = vadd.f32 %v89_v14, %v77_v11  ;;  %v98_v17 = vadd.f32 %v89_v14, %v78_v12  ;;  %v99_v18 = vadd.f32 %v89_v14, %v79_v13 }
  0xbe   :  { %v100_v41 = vadd.f32 %v94_v37, %v80_v36  ;;  %v101_v43 = vadd.f32 %v94_v37, %v81_v38  ;;  %v102_v45 = vadd.f32 %v94_v37, %v82_v39  ;;  %v103_v48 = vadd.f32 %v94_v37, %v83_v40 }
  0xbf   :  { %v152_v19 = vmul.f32 -1.442695, %v96_v15  ;;  %v153_v20 = vmul.f32 -1.442695, %v97_v16  ;;  %v154_v21 = vmul.f32 -1.442695, %v98_v17 }
  0xc0   :  { %v155_v22 = vmul.f32 -1.442695, %v99_v18 }
  0xc1   :  { %167 = vpow2.f32 %v152_v19 }
  0xc2   :  { %169 = vpow2.f32 %v153_v20 }
  0xc3   :  { %171 = vpow2.f32 %v154_v21 }
  0xc4   :  { %173 = vpow2.f32 %v155_v22 }
  0xcb   :  { %v168_v23 = vpop.eup %167 }
  0xcc   :  { %v170_v24 = vpop.eup %169  ;;  %v116_v25 = vadd.f32 1.0, %v168_v23 }
  0xcd   :  { %v172_v26 = vpop.eup %171  ;;  %v117_v27 = vadd.f32 1.0, %v170_v24 }
  0xce   :  { %v174_v28 = vpop.eup %173  ;;  %v118_v29 = vadd.f32 1.0, %v172_v26  ;;  %175 = vrcp.f32 %v116_v25 }
  0xcf   :  { %v119_v31 = vadd.f32 1.0, %v174_v28  ;;  %177 = vrcp.f32 %v117_v27 }
  0xd0   :  { %179 = vrcp.f32 %v118_v29 }
  0xd1   :  { %181 = vrcp.f32 %v119_v31 }
  0xd8   :  { %v176_v42 = vpop.eup %175 }
  0xd9   :  { %v178_v44 = vpop.eup %177  ;;  %v128_v46 = vmul.f32 %v176_v42, %v100_v41 }
  0xda   :  { %v180_v47 = vpop.eup %179  ;;  %v129_v49 = vmul.f32 %v178_v44, %v101_v43 }
  0xdb   :  { %v182_v50 = vpop.eup %181  ;;  %v130_v51 = vmul.f32 %v180_v47, %v102_v45  ;;  %132 = vst [vmem:[#allocation8] sm:$0xff] %v128_v46 }
  0xdc   :  { %v131_v52 = vmul.f32 %v182_v50, %v103_v48  ;;  %133 = vst [vmem:[#allocation8 + $0x8] sm:$0xff] %v129_v49 }
  0xdd   :  { %134 = vst [vmem:[#allocation8 + $0x10] sm:$0xff] %v130_v51 }
  0xde   :  { %135 = vst [vmem:[#allocation8 + $0x18] sm:$0xff] %v131_v52 }
  0xdf   :  { %260 = shalt.err (!%p257_p0)
}
  0xe0   :  { %s261_s27 = scalar_lea.hbm %s363_s3, 512 }
  0xe1   :  { %p262_p1 = scmp.ne.s32.totalorder %s363_s3, %s261_s27  ;;  %p265_p2 = scmp.lt.u32.totalorder %s261_s27, %s363_s3 }
  0xe3   :  { %p267_p3 = pnand %p265_p2, %p262_p1 }
  0xe5   :  { %270 = shalt.err (!%p267_p3)
}
  0xe6   :  { %145 = dma.vmem_to_hbm [thread:$0]  %s143_s22, 512, %s363_s3, [#allocation4]  }
  0xe7   :  { %275 = dma.done.wait [#allocation4], 512  }
  0xe8   :  { %276 = vsyncadd [#allocation4], 4294966784 }
  0xe9   :  { %149 = vsyncpa [#allocation3], 1 }
  0xea   :  { %150 = vsyncpa [#allocation6], 1 }
  0xeb   :  { %151 = vsyncpa [#allocation4], 1 }

</bundles_post_ra>
